<compile_context>
chip_gen: v5e
topology: v5e:2x2
jax: 0.10.0
libtpu: 0.0.40
codegen_flags: <defaults>
</compile_context>

<pallas_src>
import numpy as np
import jax
import jax.numpy as jnp
from jax.experimental import pallas as pl
from jax.experimental.pallas import tpu as pltpu


# ---------------------------------------------------------------------------
# Host-side: build the linear "pad + correlate + interleave" synthesis operators.
# ---------------------------------------------------------------------------
def _pad_matrix(N, p, mode):
    P = np.zeros((N + 2 * p, N), np.float32)
    P[p:p + N, :] = np.eye(N, dtype=np.float32)
    for j in range(p):
        li = p - 1 - j            # left padded row  (index -(j+1))
        ri = N + p + j            # right padded row (index N + j)
        if mode == "antireflect":
            P[li, 0] += 2.0
            P[li, j + 1] -= 1.0
            P[ri, N - 1] += 2.0
            P[ri, N - 2 - j] -= 1.0
        elif mode == "reflect":
            P[li, j + 1] += 1.0
            P[ri, N - 2 - j] += 1.0
        elif mode == "replicate":
            P[li, 0] += 1.0
            P[ri, N - 1] += 1.0
        elif mode == "circular":
            P[li, N - 1 - j] += 1.0
            P[ri, j] += 1.0
        elif mode == "constant":
            pass  # zero padding
        else:
            raise ValueError(f"unknown padding_mode {mode!r}")
    return P


def _conv_matrix(taps, N, p):
    Kh = len(taps)
    C = np.zeros((N, N + 2 * p), np.float32)
    for t in range(N):
        for j in range(Kh):
            C[t, t + j] = taps[j]
    return C


def synthesis_matrix(filt, N, p, mode):
    """(2N, N) matrix implementing pad + correlate(even/odd) + interleave."""
    filt = np.asarray(filt, np.float32)
    rev = filt[::-1]
    he, ho = rev[1::2], rev[0::2]     # flipped even / odd polyphase taps
    P = _pad_matrix(N, p, mode)
    Ce = _conv_matrix(he, N, p) @ P   # (N, N)
    Co = _conv_matrix(ho, N, p) @ P   # (N, N)
    S = np.zeros((2 * N, N), np.float32)
    S[0::2] = Ce
    S[1::2] = Co
    return S


def _block_diag(mat, n):
    """n copies of `mat` along the diagonal: (n*r, n*c)."""
    r, c = mat.shape
    out = np.zeros((n * r, n * c), mat.dtype)
    for i in range(n):
        out[i * r:(i + 1) * r, i * c:(i + 1) * c] = mat
    return out


# ---------------------------------------------------------------------------
# Pallas kernel: one inverse-DWT level for nb images in H-major slab layout.
#   ss/sd/ds/dd blocks : (hc, nb*wc)      (image n -> lanes [n*wc, (n+1)*wc))
#   ShH/SgH            : (2hc, hc)
#   BDh/BDg            : (nb*wc, nb*2wc)  (block-diagonal ShW^T / SgW^T)
#   out block          : (2hc, nb*2wc)
# ---------------------------------------------------------------------------
def _iwt_level_kernel(ss_ref, sd_ref, ds_ref, dd_ref,
                      shh_ref, sgh_ref, bdh_ref, bdg_ref, out_ref):
    f32 = jnp.float32
    shh = shh_ref[...]
    sgh = sgh_ref[...]

    # Synthesis along H (batch folded into the lane axis — lane dense).
    s = (jnp.dot(shh, ss_ref[...], preferred_element_type=f32)
         + jnp.dot(sgh, sd_ref[...], preferred_element_type=f32))
    d = (jnp.dot(shh, ds_ref[...], preferred_element_type=f32)
         + jnp.dot(sgh, dd_ref[...], preferred_element_type=f32))

    # Synthesis along W via block-diagonal right operand (per-image).
    out_ref[...] = (jnp.dot(s, bdh_ref[...], preferred_element_type=f32)
                    + jnp.dot(d, bdg_ref[...], preferred_element_type=f32)
                    ).astype(out_ref.dtype)


def _choose_batch(bc, hc, wc):
    """Images per grid step: lane blocks multiple of 128 (or full), VMEM-safe."""
    cands = [nb for nb in range(1, bc + 1)
             if bc % nb == 0 and ((nb * wc) % 128 == 0 or nb == bc)]
    if not cands:
        return bc

    def step_bytes(nb):
        lanes = nb * wc
        coeff = 4 * hc * lanes                     # four coefficient blocks
        out = (2 * hc) * (2 * lanes)
        inter = 2 * (2 * hc) * lanes               # s, d intermediates
        bd = 2 * lanes * (2 * lanes)               # BDh, BDg
        mats = 2 * (2 * hc) * hc                   # ShH, SgH
        return 4 * (2 * (coeff + out) + inter + bd + mats)   # f32, dbl-buffered IO

    fitting = [nb for nb in cands if step_bytes(nb) <= (16 << 20)]
    if not fitting:
        return min(cands)
    big = [nb for nb in fitting if nb * wc >= 512]
    if big:
        nb = min(big)
        if bc // nb < 2:   # prefer >=2 grid steps when a decent smaller tile exists
            alt = [m for m in fitting if m < nb and m * wc >= 256 and bc // m >= 2]
            if alt:
                nb = max(alt)
        return nb
    return max(fitting)


def _inverse_wavelet_level(ss, sd, ds, dd, ShH, SgH, BDh, BDg,
                           *, bc, hc, wc, nb):
    lanes = nb * wc
    grid = (bc // nb,)

    coeff_spec = pl.BlockSpec((hc, lanes), lambda n: (0, n))
    mh_spec = pl.BlockSpec((2 * hc, hc), lambda n: (0, 0))
    bd_spec = pl.BlockSpec((lanes, 2 * lanes), lambda n: (0, 0))
    out_spec = pl.BlockSpec((2 * hc, 2 * lanes), lambda n: (0, n))

    flops = int(16 * hc * bc * wc * (hc + lanes))
    bytes_accessed = int(4 * (8 * hc * bc * wc + 4 * hc * hc + 4 * lanes * lanes))

    return pl.pallas_call(
        _iwt_level_kernel,
        out_shape=jax.ShapeDtypeStruct((2 * hc, 2 * bc * wc), jnp.float32),
        grid_spec=pltpu.PrefetchScalarGridSpec(
            num_scalar_prefetch=0,
            grid=grid,
            in_specs=[coeff_spec, coeff_spec, coeff_spec, coeff_spec,
                      mh_spec, mh_spec, bd_spec, bd_spec],
            out_specs=out_spec,
        ),
        compiler_params=pltpu.CompilerParams(
            dimension_semantics=("parallel",),
            vmem_limit_bytes=32 * 1024 * 1024),
        cost_estimate=pl.CostEstimate(flops=flops, transcendentals=0,
                                      bytes_accessed=bytes_accessed),
    )(ss, sd, ds, dd, ShH, SgH, BDh, BDg)


# ---------------------------------------------------------------------------
# Module wrapper (mirrors the PyTorch module's forward semantics).
# ---------------------------------------------------------------------------
class InverseWaveletBlock2D:
    def __init__(self, kernel_size, levels=1, padding_mode="antireflect",
                 scaling_kernel=None, wavelet_kernel=None,
                 normalize_approximation=False):
        assert (kernel_size - 2) % 4 == 0
        assert scaling_kernel is not None and wavelet_kernel is not None
        self.kernel_size = kernel_size
        self.levels = levels
        self.padding = (kernel_size - 2) // 4
        self.padding_mode = padding_mode
        self.h = np.asarray(scaling_kernel, np.float32)
        self.g = np.asarray(wavelet_kernel, np.float32)
        assert self.h.shape == (kernel_size,) and self.g.shape == (kernel_size,)
        self.norm = float(self.h.sum()) if normalize_approximation else 1.0
        self._mat_cache = {}
        self._jit_forward = jax.jit(self._forward)

    def _mats(self, Hc, Wc, nb):
        key = (Hc, Wc, nb)
        m = self._mat_cache.get(key)
        if m is None:
            # Fold normalize_approximation into the matrices:
            #   ShH <- n*ShH, ShW <- n*ShW  gives per-term scales n^2 / n / n / 1.
            ShH = synthesis_matrix(self.h, Hc, self.padding, self.padding_mode) * self.norm
            SgH = synthesis_matrix(self.g, Hc, self.padding, self.padding_mode)
            if Wc == Hc:
                ShW, SgW = ShH, SgH
            else:
                ShW = synthesis_matrix(self.h, Wc, self.padding, self.padding_mode) * self.norm
                SgW = synthesis_matrix(self.g, Wc, self.padding, self.padding_mode)
            BDh = _block_diag(np.ascontiguousarray(ShW.T), nb)
            BDg = _block_diag(np.ascontiguousarray(SgW.T), nb)
            m = (jnp.asarray(ShH), jnp.asarray(SgH),
                 jnp.asarray(BDh), jnp.asarray(BDg))
            self._mat_cache[key] = m
        return m

    def _forward(self, ss, sd, ds, dd):
        if isinstance(ss, (list, tuple)):
            ss = ss[-1]
        b, c, H, W = ss.shape
        bc = b * c
        Hc, Wc = H, W

        def to_slab(x):
            # (B, C, H, W) -> (H, B*C*W): lane-dense, image-major column groups.
            x = jnp.asarray(x, jnp.float32)
            return jnp.transpose(x, (2, 0, 1, 3)).reshape(x.shape[2],
                                                          bc * x.shape[3])

        x = to_slab(ss)
        for i in range(self.levels - 1, -1, -1):
            nb = _choose_batch(bc, Hc, Wc)
            ShH, SgH, BDh, BDg = self._mats(Hc, Wc, nb)
            x = _inverse_wavelet_level(x, to_slab(sd[i]), to_slab(ds[i]),
                                       to_slab(dd[i]), ShH, SgH, BDh, BDg,
                                       bc=bc, hc=Hc, wc=Wc, nb=nb)
            Hc, Wc = 2 * Hc, 2 * Wc
        # (H_out, B*C*W_out) -> (B, C, H_out, W_out)
        return jnp.transpose(x.reshape(Hc, b, c, Wc), (1, 2, 0, 3))

    def __call__(self, ss, sd, ds, dd):
        return self._jit_forward(ss, sd, ds, dd)


# ---------------------------------------------------------------------------
# Pure numpy reference (direct pad + correlate + interleave), for validation.
# ---------------------------------------------------------------------------
def _ref_pad(a, p, mode):
    assert mode == "antireflect"
    N = len(a)
    out = np.zeros(N + 2 * p, np.float64)
    out[p:p + N] = a
    for j in range(p):
        out[p - 1 - j] = 2.0 * a[0] - a[j + 1]
        out[N + p + j] = 2.0 * a[N - 1] - a[N - 2 - j]
    return out


def _ref_recon1d(a, det, h, g, p, mode):
    N = len(a)
    rev_h = np.asarray(h, np.float64)[::-1]
    rev_g = np.asarray(g, np.float64)[::-1]
    he, ho = rev_h[1::2], rev_h[0::2]
    ge, go = rev_g[1::2], rev_g[0::2]
    ap = _ref_pad(np.asarray(a, np.float64), p, mode)
    dp = _ref_pad(np.asarray(det, np.float64), p, mode)
    Kh = len(he)
    y = np.zeros(2 * N, np.float64)
    for t in range(N):
        y[2 * t] = sum(ap[t + j] * he[j] + dp[t + j] * ge[j] for j in range(Kh))
        y[2 * t + 1] = sum(ap[t + j] * ho[j] + dp[t + j] * go[j] for j in range(Kh))
    return y


def _reference_forward(ss, sd, ds, dd, h, g, p, mode, levels, norm):
    b, c, _, _ = ss.shape
    x = np.asarray(ss, np.float64)
    for i in range(levels - 1, -1, -1):
        Hc, Wc = x.shape[2], x.shape[3]
        out = np.zeros((b, c, 2 * Hc, 2 * Wc), np.float64)
        for bi in range(b):
            for ci in range(c):
                s_img = np.zeros((2 * Hc, Wc), np.float64)
                d_img = np.zeros((2 * Hc, Wc), np.float64)
                for w in range(Wc):
                    s_img[:, w] = norm * _ref_recon1d(
                        norm * x[bi, ci, :, w], sd[i][bi, ci, :, w], h, g, p, mode)
                    d_img[:, w] = _ref_recon1d(
                        norm * ds[i][bi, ci, :, w], dd[i][bi, ci, :, w], h, g, p, mode)
                for j in range(2 * Hc):
                    out[bi, ci, j, :] = _ref_recon1d(s_img[j], d_img[j], h, g, p, mode)
        x = out
    return x.astype(np.float32)


if __name__ == "__main__":
    key = jax.random.PRNGKey(0)
    keys = jax.random.split(key, 10)

    K = 6            # kernel_size = 4k + 2
    levels = 2
    b, c, H0, W0 = 2, 4, 8, 8

    # Deterministic synthetic filters (length = kernel_size), L2-normalized so
    # magnitudes stay O(1) across the 2-level reconstruction.
    h = np.asarray(jax.random.normal(keys[0], (K,), jnp.float32))
    g = np.asarray(jax.random.normal(keys[1], (K,), jnp.float32))
    h = h / np.linalg.norm(h)
    g = g / np.linalg.norm(g)

    def coeff(k, Hc, Wc):
        return jax.random.normal(k, (b, c, Hc, Wc), jnp.float32)

    # ss is the coarsest approximation; detail index (levels-1) is coarsest.
    ss = coeff(keys[2], H0, W0)
    sd = [coeff(keys[3], 2 * H0, 2 * W0), coeff(keys[4], H0, W0)]
    ds = [coeff(keys[5], 2 * H0, 2 * W0), coeff(keys[6], H0, W0)]
    dd = [coeff(keys[7], 2 * H0, 2 * W0), coeff(keys[8], H0, W0)]

    block = InverseWaveletBlock2D(kernel_size=K, levels=levels,
                                  padding_mode="antireflect",
                                  scaling_kernel=h, wavelet_kernel=g,
                                  normalize_approximation=False)

    out = block(ss, sd, ds, dd)
    out = jax.block_until_ready(out)
    assert out.shape == (b, c, H0 * 2 ** levels, W0 * 2 ** levels), out.shape

    ref = _reference_forward(np.asarray(ss),
                             [np.asarray(a) for a in sd],
                             [np.asarray(a) for a in ds],
                             [np.asarray(a) for a in dd],
                             h, g, block.padding, "antireflect",
                             levels, block.norm)
    # Default MXU precision (single bf16 pass) -> tolerance scaled to output
    # magnitude; algorithmic bugs would be O(|ref|).
    scale = float(np.max(np.abs(ref)))
    np.testing.assert_allclose(np.asarray(out), ref,
                               rtol=2e-2, atol=2e-2 * max(scale, 1.0))

    print("KERNEL_OK")
</pallas_src>

<mosaic_0001>
module attributes {stable_mosaic.version = 11 : i64} {
  func.func @_iwt_level_kernel(%arg0: i32, %arg1: memref<8x64xf32, #tpu.memory_space<vmem>>, %arg2: memref<8x64xf32, #tpu.memory_space<vmem>>, %arg3: memref<8x64xf32, #tpu.memory_space<vmem>>, %arg4: memref<8x64xf32, #tpu.memory_space<vmem>>, %arg5: memref<16x8xf32, #tpu.memory_space<vmem>>, %arg6: memref<16x8xf32, #tpu.memory_space<vmem>>, %arg7: memref<64x128xf32, #tpu.memory_space<vmem>>, %arg8: memref<64x128xf32, #tpu.memory_space<vmem>>, %arg9: memref<16x128xf32, #tpu.memory_space<vmem>>) attributes {dimension_semantics = [#tpu.dimension_semantics<parallel>], iteration_bounds = array<i64: 1>, scalar_prefetch = 0 : i64, scratch_operands = 0 : i64, tpu.core_type = #tpu.core_type<tc>, window_params = [{transform_indices = @transform_0, window_bounds = array<i64: 8, 64>}, {transform_indices = @transform_1, window_bounds = array<i64: 8, 64>}, {transform_indices = @transform_2, window_bounds = array<i64: 8, 64>}, {transform_indices = @transform_3, window_bounds = array<i64: 8, 64>}, {pipeline_mode = #tpu.pipeline_mode<synchronous>, transform_indices = @transform_4, window_bounds = array<i64: 16, 8>}, {pipeline_mode = #tpu.pipeline_mode<synchronous>, transform_indices = @transform_5, window_bounds = array<i64: 16, 8>}, {pipeline_mode = #tpu.pipeline_mode<synchronous>, transform_indices = @transform_6, window_bounds = array<i64: 64, 128>}, {pipeline_mode = #tpu.pipeline_mode<synchronous>, transform_indices = @transform_7, window_bounds = array<i64: 64, 128>}, {transform_indices = @transform_8, window_bounds = array<i64: 16, 128>}]} {
    %c0 = arith.constant 0 : index
    %c0_0 = arith.constant 0 : index
    %0 = vector.load %arg5[%c0, %c0_0] : memref<16x8xf32, #tpu.memory_space<vmem>>, vector<16x8xf32>
    %c0_1 = arith.constant 0 : index
    %c0_2 = arith.constant 0 : index
    %1 = vector.load %arg6[%c0_1, %c0_2] : memref<16x8xf32, #tpu.memory_space<vmem>>, vector<16x8xf32>
    %c0_3 = arith.constant 0 : index
    %c0_4 = arith.constant 0 : index
    %2 = vector.load %arg1[%c0_3, %c0_4] : memref<8x64xf32, #tpu.memory_space<vmem>>, vector<8x64xf32>
    %cst = arith.constant dense<0.000000e+00> : vector<16x64xf32>
    %3 = tpu.matmul %0, %2, %cst {dimension_numbers = #tpu.dot_dimension_numbers<[1], [0], [0], [1], [0, 0, 1, 1], [], []>} : vector<16x8xf32>, vector<8x64xf32>, vector<16x64xf32> -> vector<16x64xf32>
    %c0_5 = arith.constant 0 : index
    %c0_6 = arith.constant 0 : index
    %4 = vector.load %arg2[%c0_5, %c0_6] : memref<8x64xf32, #tpu.memory_space<vmem>>, vector<8x64xf32>
    %cst_7 = arith.constant dense<0.000000e+00> : vector<16x64xf32>
    %5 = tpu.matmul %1, %4, %cst_7 {dimension_numbers = #tpu.dot_dimension_numbers<[1], [0], [0], [1], [0, 0, 1, 1], [], []>} : vector<16x8xf32>, vector<8x64xf32>, vector<16x64xf32> -> vector<16x64xf32>
    %6 = arith.addf %3, %5 : vector<16x64xf32>
    %c0_8 = arith.constant 0 : index
    %c0_9 = arith.constant 0 : index
    %7 = vector.load %arg3[%c0_8, %c0_9] : memref<8x64xf32, #tpu.memory_space<vmem>>, vector<8x64xf32>
    %cst_10 = arith.constant dense<0.000000e+00> : vector<16x64xf32>
    %8 = tpu.matmul %0, %7, %cst_10 {dimension_numbers = #tpu.dot_dimension_numbers<[1], [0], [0], [1], [0, 0, 1, 1], [], []>} : vector<16x8xf32>, vector<8x64xf32>, vector<16x64xf32> -> vector<16x64xf32>
    %c0_11 = arith.constant 0 : index
    %c0_12 = arith.constant 0 : index
    %9 = vector.load %arg4[%c0_11, %c0_12] : memref<8x64xf32, #tpu.memory_space<vmem>>, vector<8x64xf32>
    %cst_13 = arith.constant dense<0.000000e+00> : vector<16x64xf32>
    %10 = tpu.matmul %1, %9, %cst_13 {dimension_numbers = #tpu.dot_dimension_numbers<[1], [0], [0], [1], [0, 0, 1, 1], [], []>} : vector<16x8xf32>, vector<8x64xf32>, vector<16x64xf32> -> vector<16x64xf32>
    %11 = arith.addf %8, %10 : vector<16x64xf32>
    %c0_14 = arith.constant 0 : index
    %c0_15 = arith.constant 0 : index
    %12 = vector.load %arg7[%c0_14, %c0_15] : memref<64x128xf32, #tpu.memory_space<vmem>>, vector<64x128xf32>
    %cst_16 = arith.constant dense<0.000000e+00> : vector<16x128xf32>
    %13 = tpu.matmul %6, %12, %cst_16 {dimension_numbers = #tpu.dot_dimension_numbers<[1], [0], [0], [1], [0, 0, 1, 1], [], []>} : vector<16x64xf32>, vector<64x128xf32>, vector<16x128xf32> -> vector<16x128xf32>
    %c0_17 = arith.constant 0 : index
    %c0_18 = arith.constant 0 : index
    %14 = vector.load %arg8[%c0_17, %c0_18] : memref<64x128xf32, #tpu.memory_space<vmem>>, vector<64x128xf32>
    %cst_19 = arith.constant dense<0.000000e+00> : vector<16x128xf32>
    %15 = tpu.matmul %11, %14, %cst_19 {dimension_numbers = #tpu.dot_dimension_numbers<[1], [0], [0], [1], [0, 0, 1, 1], [], []>} : vector<16x64xf32>, vector<64x128xf32>, vector<16x128xf32> -> vector<16x128xf32>
    %16 = arith.addf %13, %15 : vector<16x128xf32>
    %c0_20 = arith.constant 0 : index
    %c0_21 = arith.constant 0 : index
    %17 = vector.load %arg9[%c0_20, %c0_21] : memref<16x128xf32, #tpu.memory_space<vmem>>, vector<16x128xf32>
    tpu.vector_store %arg9[%c0_20, %c0_21], %16 {strides = array<i32>} : memref<16x128xf32, #tpu.memory_space<vmem>>, vector<16x128xf32>,
    return
  }
  func.func @transform_0(%arg0: i32) -> (i32, i32) {
    %c0_i32 = arith.constant 0 : i32
    %c0_i32_0 = arith.constant 0 : i32
    return %c0_i32, %arg0 : i32, i32
  }
  func.func @transform_1(%arg0: i32) -> (i32, i32) {
    %c0_i32 = arith.constant 0 : i32
    %c0_i32_0 = arith.constant 0 : i32
    return %c0_i32, %arg0 : i32, i32
  }
  func.func @transform_2(%arg0: i32) -> (i32, i32) {
    %c0_i32 = arith.constant 0 : i32
    %c0_i32_0 = arith.constant 0 : i32
    return %c0_i32, %arg0 : i32, i32
  }
  func.func @transform_3(%arg0: i32) -> (i32, i32) {
    %c0_i32 = arith.constant 0 : i32
    %c0_i32_0 = arith.constant 0 : i32
    return %c0_i32, %arg0 : i32, i32
  }
  func.func @transform_4(%arg0: i32) -> (i32, i32) {
    %c0_i32 = arith.constant 0 : i32
    %c0_i32_0 = arith.constant 0 : i32
    %c0_i32_1 = arith.constant 0 : i32
    return %c0_i32, %c0_i32_0 : i32, i32
  }
  func.func @transform_5(%arg0: i32) -> (i32, i32) {
    %c0_i32 = arith.constant 0 : i32
    %c0_i32_0 = arith.constant 0 : i32
    %c0_i32_1 = arith.constant 0 : i32
    return %c0_i32, %c0_i32_0 : i32, i32
  }
  func.func @transform_6(%arg0: i32) -> (i32, i32) {
    %c0_i32 = arith.constant 0 : i32
    %c0_i32_0 = arith.constant 0 : i32
    %c0_i32_1 = arith.constant 0 : i32
    return %c0_i32, %c0_i32_0 : i32, i32
  }
  func.func @transform_7(%arg0: i32) -> (i32, i32) {
    %c0_i32 = arith.constant 0 : i32
    %c0_i32_0 = arith.constant 0 : i32
    %c0_i32_1 = arith.constant 0 : i32
    return %c0_i32, %c0_i32_0 : i32, i32
  }
  func.func @transform_8(%arg0: i32) -> (i32, i32) {
    %c0_i32 = arith.constant 0 : i32
    %c0_i32_0 = arith.constant 0 : i32
    return %c0_i32, %arg0 : i32, i32
  }
}

module attributes {stable_mosaic.version = 11 : i64} {
  func.func @_iwt_level_kernel(%arg0: i32, %arg1: memref<16x128xf32, #tpu.memory_space<vmem>>, %arg2: memref<16x128xf32, #tpu.memory_space<vmem>>, %arg3: memref<16x128xf32, #tpu.memory_space<vmem>>, %arg4: memref<16x128xf32, #tpu.memory_space<vmem>>, %arg5: memref<32x16xf32, #tpu.memory_space<vmem>>, %arg6: memref<32x16xf32, #tpu.memory_space<vmem>>, %arg7: memref<128x256xf32, #tpu.memory_space<vmem>>, %arg8: memref<128x256xf32, #tpu.memory_space<vmem>>, %arg9: memref<32x256xf32, #tpu.memory_space<vmem>>) attributes {dimension_semantics = [#tpu.dimension_semantics<parallel>], iteration_bounds = array<i64: 1>, scalar_prefetch = 0 : i64, scratch_operands = 0 : i64, tpu.core_type = #tpu.core_type<tc>, window_params = [{transform_indices = @transform_0, window_bounds = array<i64: 16, 128>}, {transform_indices = @transform_1, window_bounds = array<i64: 16, 128>}, {transform_indices = @transform_2, window_bounds = array<i64: 16, 128>}, {transform_indices = @transform_3, window_bounds = array<i64: 16, 128>}, {pipeline_mode = #tpu.pipeline_mode<synchronous>, transform_indices = @transform_4, window_bounds = array<i64: 32, 16>}, {pipeline_mode = #tpu.pipeline_mode<synchronous>, transform_indices = @transform_5, window_bounds = array<i64: 32, 16>}, {pipeline_mode = #tpu.pipeline_mode<synchronous>, transform_indices = @transform_6, window_bounds = array<i64: 128, 256>}, {pipeline_mode = #tpu.pipeline_mode<synchronous>, transform_indices = @transform_7, window_bounds = array<i64: 128, 256>}, {transform_indices = @transform_8, window_bounds = array<i64: 32, 256>}]} {
    %c0 = arith.constant 0 : index
    %c0_0 = arith.constant 0 : index
    %0 = vector.load %arg5[%c0, %c0_0] : memref<32x16xf32, #tpu.memory_space<vmem>>, vector<32x16xf32>
    %c0_1 = arith.constant 0 : index
    %c0_2 = arith.constant 0 : index
    %1 = vector.load %arg6[%c0_1, %c0_2] : memref<32x16xf32, #tpu.memory_space<vmem>>, vector<32x16xf32>
    %c0_3 = arith.constant 0 : index
    %c0_4 = arith.constant 0 : index
    %2 = vector.load %arg1[%c0_3, %c0_4] : memref<16x128xf32, #tpu.memory_space<vmem>>, vector<16x128xf32>
    %cst = arith.constant dense<0.000000e+00> : vector<32x128xf32>
    %3 = tpu.matmul %0, %2, %cst {dimension_numbers = #tpu.dot_dimension_numbers<[1], [0], [0], [1], [0, 0, 1, 1], [], []>} : vector<32x16xf32>, vector<16x128xf32>, vector<32x128xf32> -> vector<32x128xf32>
    %c0_5 = arith.constant 0 : index
    %c0_6 = arith.constant 0 : index
    %4 = vector.load %arg2[%c0_5, %c0_6] : memref<16x128xf32, #tpu.memory_space<vmem>>, vector<16x128xf32>
    %cst_7 = arith.constant dense<0.000000e+00> : vector<32x128xf32>
    %5 = tpu.matmul %1, %4, %cst_7 {dimension_numbers = #tpu.dot_dimension_numbers<[1], [0], [0], [1], [0, 0, 1, 1], [], []>} : vector<32x16xf32>, vector<16x128xf32>, vector<32x128xf32> -> vector<32x128xf32>
    %6 = arith.addf %3, %5 : vector<32x128xf32>
    %c0_8 = arith.constant 0 : index
    %c0_9 = arith.constant 0 : index
    %7 = vector.load %arg3[%c0_8, %c0_9] : memref<16x128xf32, #tpu.memory_space<vmem>>, vector<16x128xf32>
    %cst_10 = arith.constant dense<0.000000e+00> : vector<32x128xf32>
    %8 = tpu.matmul %0, %7, %cst_10 {dimension_numbers = #tpu.dot_dimension_numbers<[1], [0], [0], [1], [0, 0, 1, 1], [], []>} : vector<32x16xf32>, vector<16x128xf32>, vector<32x128xf32> -> vector<32x128xf32>
    %c0_11 = arith.constant 0 : index
    %c0_12 = arith.constant 0 : index
    %9 = vector.load %arg4[%c0_11, %c0_12] : memref<16x128xf32, #tpu.memory_space<vmem>>, vector<16x128xf32>
    %cst_13 = arith.constant dense<0.000000e+00> : vector<32x128xf32>
    %10 = tpu.matmul %1, %9, %cst_13 {dimension_numbers = #tpu.dot_dimension_numbers<[1], [0], [0], [1], [0, 0, 1, 1], [], []>} : vector<32x16xf32>, vector<16x128xf32>, vector<32x128xf32> -> vector<32x128xf32>
    %11 = arith.addf %8, %10 : vector<32x128xf32>
    %c0_14 = arith.constant 0 : index
    %c0_15 = arith.constant 0 : index
    %12 = vector.load %arg7[%c0_14, %c0_15] : memref<128x256xf32, #tpu.memory_space<vmem>>, vector<128x256xf32>
    %cst_16 = arith.constant dense<0.000000e+00> : vector<32x256xf32>
    %13 = tpu.matmul %6, %12, %cst_16 {dimension_numbers = #tpu.dot_dimension_numbers<[1], [0], [0], [1], [0, 0, 1, 1], [], []>} : vector<32x128xf32>, vector<128x256xf32>, vector<32x256xf32> -> vector<32x256xf32>
    %c0_17 = arith.constant 0 : index
    %c0_18 = arith.constant 0 : index
    %14 = vector.load %arg8[%c0_17, %c0_18] : memref<128x256xf32, #tpu.memory_space<vmem>>, vector<128x256xf32>
    %cst_19 = arith.constant dense<0.000000e+00> : vector<32x256xf32>
    %15 = tpu.matmul %11, %14, %cst_19 {dimension_numbers = #tpu.dot_dimension_numbers<[1], [0], [0], [1], [0, 0, 1, 1], [], []>} : vector<32x128xf32>, vector<128x256xf32>, vector<32x256xf32> -> vector<32x256xf32>
    %16 = arith.addf %13, %15 : vector<32x256xf32>
    %c0_20 = arith.constant 0 : index
    %c0_21 = arith.constant 0 : index
    %17 = vector.load %arg9[%c0_20, %c0_21] : memref<32x256xf32, #tpu.memory_space<vmem>>, vector<32x256xf32>
    tpu.vector_store %arg9[%c0_20, %c0_21], %16 {strides = array<i32>} : memref<32x256xf32, #tpu.memory_space<vmem>>, vector<32x256xf32>,
    return
  }
  func.func @transform_0(%arg0: i32) -> (i32, i32) {
    %c0_i32 = arith.constant 0 : i32
    %c0_i32_0 = arith.constant 0 : i32
    return %c0_i32, %arg0 : i32, i32
  }
  func.func @transform_1(%arg0: i32) -> (i32, i32) {
    %c0_i32 = arith.constant 0 : i32
    %c0_i32_0 = arith.constant 0 : i32
    return %c0_i32, %arg0 : i32, i32
  }
  func.func @transform_2(%arg0: i32) -> (i32, i32) {
    %c0_i32 = arith.constant 0 : i32
    %c0_i32_0 = arith.constant 0 : i32
    return %c0_i32, %arg0 : i32, i32
  }
  func.func @transform_3(%arg0: i32) -> (i32, i32) {
    %c0_i32 = arith.constant 0 : i32
    %c0_i32_0 = arith.constant 0 : i32
    return %c0_i32, %arg0 : i32, i32
  }
  func.func @transform_4(%arg0: i32) -> (i32, i32) {
    %c0_i32 = arith.constant 0 : i32
    %c0_i32_0 = arith.constant 0 : i32
    %c0_i32_1 = arith.constant 0 : i32
    return %c0_i32, %c0_i32_0 : i32, i32
  }
  func.func @transform_5(%arg0: i32) -> (i32, i32) {
    %c0_i32 = arith.constant 0 : i32
    %c0_i32_0 = arith.constant 0 : i32
    %c0_i32_1 = arith.constant 0 : i32
    return %c0_i32, %c0_i32_0 : i32, i32
  }
  func.func @transform_6(%arg0: i32) -> (i32, i32) {
    %c0_i32 = arith.constant 0 : i32
    %c0_i32_0 = arith.constant 0 : i32
    %c0_i32_1 = arith.constant 0 : i32
    return %c0_i32, %c0_i32_0 : i32, i32
  }
  func.func @transform_7(%arg0: i32) -> (i32, i32) {
    %c0_i32 = arith.constant 0 : i32
    %c0_i32_0 = arith.constant 0 : i32
    %c0_i32_1 = arith.constant 0 : i32
    return %c0_i32, %c0_i32_0 : i32, i32
  }
  func.func @transform_8(%arg0: i32) -> (i32, i32) {
    %c0_i32 = arith.constant 0 : i32
    %c0_i32_0 = arith.constant 0 : i32
    return %c0_i32, %arg0 : i32, i32
  }
}

</mosaic_0001>

<bundles_post_ra>
// kernel: _forward.3
= control target key start
LH: loop header
LB: loop body
LE: loop exit
PB: predicated region body
PF: predicated region fallthrough
CT: control target
= control target key end

     0   :  { %vm41_vm0 = vcmask 130048   ;;  %s719_s1 = inlined_call_operand.vmem [shape: f32[16,128], index: 1, kind: input, shape index: {}]   ;;  %s720_s0 = inlined_call_operand.vmem [shape: f32[16,128], index: 0, kind: input, shape index: {}]   ;;  %s721_s3 = inlined_call_operand.vmem [shape: f32[16,128], index: 3, kind: input, shape index: {}]   ;;  %s722_s2 = inlined_call_operand.vmem [shape: f32[16,128], index: 2, kind: input, shape index: {}]   ;;  %s723_s5 = inlined_call_operand.vmem [shape: f32[32,16], index: 5, kind: input, shape index: {}]   ;;  %s724_s4 = inlined_call_operand.vmem [shape: f32[32,16], index: 4, kind: input, shape index: {}]   ;;  %s725_s6 = inlined_call_operand.vmem [shape: f32[128,256], index: 6, kind: input, shape index: {}]   ;;  %s726_s7 = inlined_call_operand.vmem [shape: f32[128,256], index: 7, kind: input, shape index: {}]   ;;  %s727_s8 = inlined_call_operand.vmem [shape: f32[32,256], index: 8, kind: output, shape index: {}]  }
   0x1   :  { %v40_v0 = vld [vmem:[%s719_s1 + $0x8] sm:$0xff]  ;;  %v39_v4 = vld [vmem:[%s719_s1] sm:$0xff]  ;;  %v216_v10 = vld [vmem:[%s725_s6 + $0xf0] sm:$0xff] }
   0x2   :  { %v38_v1 = vld [vmem:[%s720_s0 + $0x8] sm:$0xff]  ;;  %68 = vmatpush.msra.mxu0 %v40_v0  ;;  %v37_v5 = vld [vmem:[%s720_s0] sm:$0xff]  ;;  %v217_v11 = vld [vmem:[%s725_s6 + $0xf8] sm:$0xff] }
   0x3   :  { %v127_v2 = vld [vmem:[%s721_s3 + $0x8] sm:$0xff]  ;;  %109 = vmatpush.msra.mxu1 %v38_v1  ;;  %v126_v6 = vld [vmem:[%s721_s3] sm:$0xff]  ;;  %v248_v14 = vld [vmem:[%s726_s7 + $0xf0] sm:$0xff] }
   0x4   :  { %v125_v3 = vld [vmem:[%s722_s2 + $0x8] sm:$0xff]  ;;  %142 = vmatpush.msra.mxu2 %v127_v2  ;;  %v124_v7 = vld [vmem:[%s722_s2] sm:$0xff]  ;;  %69 = vmatpush.msra.mxu0 %v39_v4  ;;  %v249_v15 = vld [vmem:[%s726_s7 + $0xf8] sm:$0xff] }
   0x5   :  { %171 = vmatpush.msra.mxu3 %v125_v3  ;;  %v33_v8 = vld [vmem:[%s723_s5] sm:$0xff]  ;;  %110 = vmatpush.msra.mxu1 %v37_v5  ;;  %v215_v13 = vld [vmem:[%s725_s6 + $0xe8] sm:$0xff]  ;;  %v212_v16 = vld [vmem:[%s725_s6 + $0xd0] sm:$0xff] }
   0x6   :  { %v29_v9 = vld [vmem:[%s724_s4] sm:$0xff]  ;;  %143 = vmatpush.msra.mxu2 %v126_v6  ;;  %378 = vmatmul.msk.f32.vlgmr.msra.gmra.mxu0 %vm41_vm0, %v33_v8  ;;  %v213_v17 = vld [vmem:[%s725_s6 + $0xd8] sm:$0xff]  ;;  %v34_v19 = vld [vmem:[%s723_s5 + $0x8] sm:$0xff] }
   0x7   :  { %172 = vmatpush.msra.mxu3 %v124_v7  ;;  %382 = vmatmul.msk.f32.vlgmr.msra.gmra.mxu1 %vm41_vm0, %v29_v9  ;;  %v214_v12 = vld [vmem:[%s725_s6 + $0xe0] sm:$0xff]  ;;  %v247_v20 = vld [vmem:[%s726_s7 + $0xe8] sm:$0xff]  ;;  %v244_v22 = vld [vmem:[%s726_s7 + $0xd0] sm:$0xff] }
   0x8   :  { %386 = vmatmul.msk.f32.vlgmr.msra.gmra.mxu2 %vm41_vm0, %v33_v8  ;;  %390 = vmatmul.msk.f32.vlgmr.msra.gmra.mxu3 %vm41_vm0, %v29_v9  ;;  %v246_v18 = vld [vmem:[%s726_s7 + $0xe0] sm:$0xff]  ;;  %v30_v21 = vld [vmem:[%s724_s4 + $0x8] sm:$0xff]  ;;  %v245_v23 = vld [vmem:[%s726_s7 + $0xd8] sm:$0xff] }
   0x9   :  { %308 = vmatpush.msrb.mxu2 %v216_v10  ;;  %337 = vmatpush.msrb.mxu3 %v217_v11  ;;  %v210_v24 = vld [vmem:[%s725_s6 + $0xc0] sm:$0xff]  ;;  %v211_v25 = vld [vmem:[%s725_s6 + $0xc8] sm:$0xff]  ;;  %v208_v28 = vld [vmem:[%s725_s6 + $0xb0] sm:$0xff] }
   0xa   :  { %250 = vmatpush.msrb.mxu0 %v248_v14  ;;  %279 = vmatpush.msrb.mxu1 %v249_v15  ;;  %v242_v26 = vld [vmem:[%s726_s7 + $0xc0] sm:$0xff]  ;;  %v243_v27 = vld [vmem:[%s726_s7 + $0xc8] sm:$0xff]  ;;  %v209_v29 = vld [vmem:[%s725_s6 + $0xb8] sm:$0xff] }
   0xb   :  { %309 = vmatpush.msrb.mxu2 %v214_v12  ;;  %338 = vmatpush.msrb.mxu3 %v215_v13  ;;  %v240_v30 = vld [vmem:[%s726_s7 + $0xb0] sm:$0xff]  ;;  %v241_v31 = vld [vmem:[%s726_s7 + $0xb8] sm:$0xff]  ;;  %v206_v32 = vld [vmem:[%s725_s6 + $0xa0] sm:$0xff] }
   0xc   :  { %251 = vmatpush.msrb.mxu0 %v246_v18  ;;  %280 = vmatpush.msrb.mxu1 %v247_v20  ;;  %v207_v33 = vld [vmem:[%s725_s6 + $0xa8] sm:$0xff]  ;;  %v238_v34 = vld [vmem:[%s726_s7 + $0xa0] sm:$0xff]  ;;  %v35_v36 = vld [vmem:[%s723_s5 + $0x10] sm:$0xff] }
   0xd   :  { %310 = vmatpush.msrb.mxu2 %v212_v16  ;;  %339 = vmatpush.msrb.mxu3 %v213_v17  ;;  %v239_v35 = vld [vmem:[%s726_s7 + $0xa8] sm:$0xff]  ;;  %v31_v37 = vld [vmem:[%s724_s4 + $0x10] sm:$0xff]  ;;  %v205_v39 = vld [vmem:[%s725_s6 + $0x98] sm:$0xff] }
   0xe   :  { %252 = vmatpush.msrb.mxu0 %v244_v22  ;;  %281 = vmatpush.msrb.mxu1 %v245_v23  ;;  %v204_v38 = vld [vmem:[%s725_s6 + $0x90] sm:$0xff]  ;;  %v237_v41 = vld [vmem:[%s726_s7 + $0x98] sm:$0xff]  ;;  %v202_v42 = vld [vmem:[%s725_s6 + $0x80] sm:$0xff] }
   0xf   :  { %379 = vmatmul.msk.f32.gmra.mxu0 %vm41_vm0, %v34_v19  ;;  %383 = vmatmul.msk.f32.gmra.mxu1 %vm41_vm0, %v30_v21  ;;  %v236_v40 = vld [vmem:[%s726_s7 + $0x90] sm:$0xff]  ;;  %v203_v43 = vld [vmem:[%s725_s6 + $0x88] sm:$0xff]  ;;  %v234_v44 = vld [vmem:[%s726_s7 + $0x80] sm:$0xff] }
  0x10   :  { %387 = vmatmul.msk.f32.gmra.mxu2 %vm41_vm0, %v34_v19  ;;  %391 = vmatmul.msk.f32.gmra.mxu3 %vm41_vm0, %v30_v21  ;;  %v235_v45 = vld [vmem:[%s726_s7 + $0x88] sm:$0xff]  ;;  %v200_v46 = vld [vmem:[%s725_s6 + $0x70] sm:$0xff]  ;;  %v201_v47 = vld [vmem:[%s725_s6 + $0x78] sm:$0xff] }
  0x11   :  { %311 = vmatpush.msrb.mxu2 %v210_v24  ;;  %340 = vmatpush.msrb.mxu3 %v211_v25  ;;  %v232_v48 = vld [vmem:[%s726_s7 + $0x70] sm:$0xff]  ;;  %v233_v49 = vld [vmem:[%s726_s7 + $0x78] sm:$0xff]  ;;  %v198_v52 = vld [vmem:[%s725_s6 + $0x60] sm:$0xff] }
  0x12   :  { %253 = vmatpush.msrb.mxu0 %v242_v26  ;;  %282 = vmatpush.msrb.mxu1 %v243_v27  ;;  %v36_v50 = vld [vmem:[%s723_s5 + $0x18] sm:$0xff]  ;;  %v199_v53 = vld [vmem:[%s725_s6 + $0x68] sm:$0xff]  ;;  %v230_v54 = vld [vmem:[%s726_s7 + $0x60] sm:$0xff] }
  0x13   :  { %312 = vmatpush.msrb.mxu2 %v208_v28  ;;  %341 = vmatpush.msrb.mxu3 %v209_v29  ;;  %v32_v51 = vld [vmem:[%s724_s4 + $0x18] sm:$0xff]  ;;  %v231_v55 = vld [vmem:[%s726_s7 + $0x68] sm:$0xff]  ;;  %v196_v56 = vld [vmem:[%s725_s6 + $0x50] sm:$0xff] }
  0x14   :  { %254 = vmatpush.msrb.mxu0 %v240_v30  ;;  %283 = vmatpush.msrb.mxu1 %v241_v31  ;;  %v197_v57 = vld [vmem:[%s725_s6 + $0x58] sm:$0xff]  ;;  %v228_v58 = vld [vmem:[%s726_s7 + $0x50] sm:$0xff]  ;;  %v194_v60 = vld [vmem:[%s725_s6 + $0x40] sm:$0xff] }
  0x15   :  { %313 = vmatpush.msrb.mxu2 %v206_v32  ;;  %342 = vmatpush.msrb.mxu3 %v207_v33  ;;  %v229_v59 = vld [vmem:[%s726_s7 + $0x58] sm:$0xff]  ;;  %v195_v61 = vld [vmem:[%s725_s6 + $0x48] sm:$0xff]  ;;  %v226_v62 = vld [vmem:[%s726_s7 + $0x40] sm:$0xff] }
  0x16   :  { %255 = vmatpush.msrb.mxu0 %v238_v34  ;;  %284 = vmatpush.msrb.mxu1 %v239_v35  ;;  %v227_v63 = vld [vmem:[%s726_s7 + $0x48] sm:$0xff]  ;;  %v192_v0 = vld [vmem:[%s725_s6 + $0x30] sm:$0xff]  ;;  %v193_v1 = vld [vmem:[%s725_s6 + $0x38] sm:$0xff] }
  0x17   :  { %380 = vmatmul.msk.f32.gmra.mxu0 %vm41_vm0, %v35_v36  ;;  %384 = vmatmul.msk.f32.gmra.mxu1 %vm41_vm0, %v31_v37  ;;  %v190_v2 = vld [vmem:[%s725_s6 + $0x20] sm:$0xff]  ;;  %v191_v3 = vld [vmem:[%s725_s6 + $0x28] sm:$0xff]  ;;  %v188_v4 = vld [vmem:[%s725_s6 + $0x10] sm:$0xff] }
  0x18   :  { %388 = vmatmul.msk.f32.gmra.mxu2 %vm41_vm0, %v35_v36  ;;  %392 = vmatmul.msk.f32.gmra.mxu3 %vm41_vm0, %v31_v37  ;;  %v189_v5 = vld [vmem:[%s725_s6 + $0x18] sm:$0xff]  ;;  %v224_v6 = vld [vmem:[%s726_s7 + $0x30] sm:$0xff]  ;;  %v186_v8 = vld [vmem:[%s725_s6] sm:$0xff] }
  0x19   :  { %314 = vmatpush.msrb.mxu2 %v204_v38  ;;  %343 = vmatpush.msrb.mxu3 %v205_v39  ;;  %v225_v7 = vld [vmem:[%s726_s7 + $0x38] sm:$0xff]  ;;  %v187_v9 = vld [vmem:[%s725_s6 + $0x8] sm:$0xff]  ;;  %v222_v10 = vld [vmem:[%s726_s7 + $0x20] sm:$0xff] }
  0x1a   :  { %256 = vmatpush.msrb.mxu0 %v236_v40  ;;  %285 = vmatpush.msrb.mxu1 %v237_v41  ;;  %v223_v11 = vld [vmem:[%s726_s7 + $0x28] sm:$0xff]  ;;  %v220_v12 = vld [vmem:[%s726_s7 + $0x10] sm:$0xff]  ;;  %v221_v13 = vld [vmem:[%s726_s7 + $0x18] sm:$0xff] }
  0x1b   :  { %315 = vmatpush.msrb.mxu2 %v202_v42  ;;  %344 = vmatpush.msrb.mxu3 %v203_v43  ;;  %v218_v14 = vld [vmem:[%s726_s7] sm:$0xff]  ;;  %v219_v15 = vld [vmem:[%s726_s7 + $0x8] sm:$0xff] }
  0x1c   :  { %257 = vmatpush.msrb.mxu0 %v234_v44  ;;  %286 = vmatpush.msrb.mxu1 %v235_v45 }
  0x1d   :  { %316 = vmatpush.msrb.mxu2 %v200_v46  ;;  %345 = vmatpush.msrb.mxu3 %v201_v47 }
  0x1e   :  { %258 = vmatpush.msrb.mxu0 %v232_v48  ;;  %287 = vmatpush.msrb.mxu1 %v233_v49 }
  0x1f   :  { %381 = vmatmul.msk.f32.gmra.mxu0 %vm41_vm0, %v36_v50  ;;  %385 = vmatmul.msk.f32.gmra.mxu1 %vm41_vm0, %v32_v51 }
  0x20   :  { %389 = vmatmul.msk.f32.gmra.mxu2 %vm41_vm0, %v36_v50  ;;  %393 = vmatmul.msk.f32.gmra.mxu3 %vm41_vm0, %v32_v51 }
  0x21   :  { %317 = vmatpush.msrb.mxu2 %v198_v52  ;;  %346 = vmatpush.msrb.mxu3 %v199_v53 }
  0x22   :  { %259 = vmatpush.msrb.mxu0 %v230_v54  ;;  %288 = vmatpush.msrb.mxu1 %v231_v55 }
  0x23   :  { %318 = vmatpush.msrb.mxu2 %v196_v56  ;;  %347 = vmatpush.msrb.mxu3 %v197_v57 }
  0x24   :  { %260 = vmatpush.msrb.mxu0 %v228_v58  ;;  %289 = vmatpush.msrb.mxu1 %v229_v59 }
  0x25   :  { %319 = vmatpush.msrb.mxu2 %v194_v60  ;;  %348 = vmatpush.msrb.mxu3 %v195_v61 }
  0x26   :  { %261 = vmatpush.msrb.mxu0 %v226_v62  ;;  %290 = vmatpush.msrb.mxu1 %v227_v63 }
  0x27   :  { %320 = vmatpush.msrb.mxu2 %v192_v0  ;;  %349 = vmatpush.msrb.mxu3 %v193_v1 }
  0x28   :  { %262 = vmatpush.msrb.mxu0 %v224_v6  ;;  %291 = vmatpush.msrb.mxu1 %v225_v7 }
  0x29   :  { %321 = vmatpush.msrb.mxu2 %v190_v2  ;;  %350 = vmatpush.msrb.mxu3 %v191_v3 }
  0x2a   :  { %263 = vmatpush.msrb.mxu0 %v222_v10  ;;  %292 = vmatpush.msrb.mxu1 %v223_v11 }
  0x2b   :  { %322 = vmatpush.msrb.mxu2 %v188_v4  ;;  %351 = vmatpush.msrb.mxu3 %v189_v5 }
  0x2c   :  { %264 = vmatpush.msrb.mxu0 %v220_v12  ;;  %293 = vmatpush.msrb.mxu1 %v221_v13 }
  0x2d   :  { %323 = vmatpush.msrb.mxu2 %v186_v8  ;;  %352 = vmatpush.msrb.mxu3 %v187_v9 }
  0x2e   :  { %265 = vmatpush.msrb.mxu0 %v218_v14  ;;  %294 = vmatpush.msrb.mxu1 %v219_v15 }
  0x83   :  { %v71_v16 = vpop.f32.mrf.mxu0 }
  0x84   :  { %v112_v17 = vpop.f32.mrf.mxu1 }
  0x85   :  { %v113_v18 = vadd.f32 %v112_v17, %v71_v16 }
  0x87   :  { %324 = vmatmul.f32.vlgmr.msrb.gmra.mxu2 %v113_v18  ;;  %353 = vmatmul.f32.vlgmr.msrb.gmra.mxu3 %v113_v18 }
  0x8b   :  { %v145_v19 = vpop.f32.mrf.mxu2  ;;  %v174_v20 = vpop.f32.mrf.mxu3 }
  0x8c   :  { %v175_v21 = vadd.f32 %v174_v20, %v145_v19  ;;  %v74_v22 = vpop.f32.mrf.mxu0  ;;  %v115_v23 = vpop.f32.mrf.mxu1 }
  0x8d   :  { %v116_v24 = vadd.f32 %v115_v23, %v74_v22 }
  0x8e   :  { %266 = vmatmul.f32.vlgmr.msrb.gmra.mxu0 %v175_v21  ;;  %295 = vmatmul.f32.vlgmr.msrb.gmra.mxu1 %v175_v21 }
  0x8f   :  { %327 = vmatmul.f32.gmra.mxu2 %v116_v24  ;;  %356 = vmatmul.f32.gmra.mxu3 %v116_v24 }
  0x93   :  { %v148_v25 = vpop.f32.mrf.mxu2  ;;  %v177_v26 = vpop.f32.mrf.mxu3 }
  0x94   :  { %v178_v27 = vadd.f32 %v177_v26, %v148_v25  ;;  %v77_v28 = vpop.f32.mrf.mxu0  ;;  %v118_v29 = vpop.f32.mrf.mxu1 }
  0x95   :  { %v119_v30 = vadd.f32 %v118_v29, %v77_v28 }
  0x96   :  { %269 = vmatmul.f32.gmra.mxu0 %v178_v27  ;;  %298 = vmatmul.f32.gmra.mxu1 %v178_v27 }
  0x97   :  { %330 = vmatmul.f32.gmra.mxu2 %v119_v30  ;;  %359 = vmatmul.f32.gmra.mxu3 %v119_v30 }
  0x9b   :  { %v151_v31 = vpop.f32.mrf.mxu2  ;;  %v180_v32 = vpop.f32.mrf.mxu3 }
  0x9c   :  { %v181_v33 = vadd.f32 %v180_v32, %v151_v31  ;;  %v80_v34 = vpop.f32.mrf.mxu0  ;;  %v121_v35 = vpop.f32.mrf.mxu1 }
  0x9d   :  { %v122_v36 = vadd.f32 %v121_v35, %v80_v34 }
  0x9e   :  { %272 = vmatmul.f32.gmra.mxu0 %v181_v33  ;;  %301 = vmatmul.f32.gmra.mxu1 %v181_v33 }
  0x9f   :  { %333 = vmatmul.f32.gmra.mxu2 %v122_v36  ;;  %362 = vmatmul.f32.gmra.mxu3 %v122_v36 }
  0xa3   :  { %v154_v37 = vpop.f32.mrf.mxu2  ;;  %v183_v38 = vpop.f32.mrf.mxu3 }
  0xa4   :  { %v184_v39 = vadd.f32 %v183_v38, %v154_v37 }
  0xa6   :  { %275 = vmatmul.f32.gmra.mxu0 %v184_v39  ;;  %304 = vmatmul.f32.gmra.mxu1 %v184_v39 }
 0x10a   :  { %v325_v40 = vpop.f32.mrf.mxu2  ;;  %v354_v41 = vpop.f32.mrf.mxu3 }
 0x10b   :  { %v267_v42 = vpop.f32.mrf.mxu0  ;;  %v296_v43 = vpop.f32.mrf.mxu1 }
 0x10c   :  { %v326_v44 = vadd.f32 %v325_v40, %v267_v42  ;;  %v355_v45 = vadd.f32 %v354_v41, %v296_v43 }
 0x10e   :  { %366 = vst [vmem:[%s727_s8] sm:$0xff] %v326_v44 }
 0x10f   :  { %367 = vst [vmem:[%s727_s8 + $0x8] sm:$0xff] %v355_v45 }
 0x112   :  { %v328_v46 = vpop.f32.mrf.mxu2  ;;  %v357_v47 = vpop.f32.mrf.mxu3 }
 0x113   :  { %v270_v48 = vpop.f32.mrf.mxu0  ;;  %v299_v49 = vpop.f32.mrf.mxu1 }
 0x114   :  { %v329_v50 = vadd.f32 %v328_v46, %v270_v48  ;;  %v358_v51 = vadd.f32 %v357_v47, %v299_v49 }
 0x116   :  { %368 = vst [vmem:[%s727_s8 + $0x10] sm:$0xff] %v329_v50 }
 0x117   :  { %369 = vst [vmem:[%s727_s8 + $0x18] sm:$0xff] %v358_v51 }
 0x11a   :  { %v331_v52 = vpop.f32.mrf.mxu2  ;;  %v360_v53 = vpop.f32.mrf.mxu3 }
 0x11b   :  { %v273_v54 = vpop.f32.mrf.mxu0  ;;  %v302_v55 = vpop.f32.mrf.mxu1 }
 0x11c   :  { %v332_v56 = vadd.f32 %v331_v52, %v273_v54  ;;  %v361_v57 = vadd.f32 %v360_v53, %v302_v55 }
 0x11e   :  { %370 = vst [vmem:[%s727_s8 + $0x20] sm:$0xff] %v332_v56 }
 0x11f   :  { %371 = vst [vmem:[%s727_s8 + $0x28] sm:$0xff] %v361_v57 }
 0x122   :  { %v334_v58 = vpop.f32.mrf.mxu2  ;;  %v363_v59 = vpop.f32.mrf.mxu3 }
 0x123   :  { %v276_v60 = vpop.f32.mrf.mxu0  ;;  %v305_v61 = vpop.f32.mrf.mxu1 }
 0x124   :  { %v335_v62 = vadd.f32 %v334_v58, %v276_v60  ;;  %v364_v63 = vadd.f32 %v363_v59, %v305_v61 }
 0x126   :  { %372 = vst [vmem:[%s727_s8 + $0x30] sm:$0xff] %v335_v62 }
 0x127   :  { %373 = vst [vmem:[%s727_s8 + $0x38] sm:$0xff] %v364_v63 }

// kernel: _forward.2
= control target key start
LH: loop header
LB: loop body
LE: loop exit
PB: predicated region body
PF: predicated region fallthrough
CT: control target
= control target key end

     0   :  { %vm35_vm0 = vcmask 64512   ;;  %vm158_vm1 = vcmask 523264   ;;  %s382_s3 = inlined_call_operand.vmem [shape: f32[8,64], index: 3, kind: input, shape index: {}]   ;;  %s383_s2 = inlined_call_operand.vmem [shape: f32[8,64], index: 2, kind: input, shape index: {}]   ;;  %s384_s5 = inlined_call_operand.vmem [shape: f32[16,8], index: 5, kind: input, shape index: {}]   ;;  %s385_s4 = inlined_call_operand.vmem [shape: f32[16,8], index: 4, kind: input, shape index: {}]   ;;  %s386_s1 = inlined_call_operand.vmem [shape: f32[8,64], index: 1, kind: input, shape index: {}]   ;;  %s387_s0 = inlined_call_operand.vmem [shape: f32[8,64], index: 0, kind: input, shape index: {}]   ;;  %s388_s7 = inlined_call_operand.vmem [shape: f32[64,128], index: 7, kind: input, shape index: {}]   ;;  %s389_s6 = inlined_call_operand.vmem [shape: f32[64,128], index: 6, kind: input, shape index: {}]   ;;  %s390_s8 = inlined_call_operand.vmem [shape: f32[16,128], index: 8, kind: output, shape index: {}]  }
   0x1   :  { %v95_v0 = vld [vmem:[%s382_s3] sm:$0xff]  ;;  %v157_v6 = vld [vmem:[%s388_s7 + $0x38] sm:$0xff]  ;;  %v156_v8 = vld [vmem:[%s388_s7 + $0x30] sm:$0xff] }
   0x2   :  { %v94_v1 = vld [vmem:[%s383_s2] sm:$0xff]  ;;  %111 = vmatpush.msra.mxu2 %v95_v0  ;;  %v149_v7 = vld [vmem:[%s389_s6 + $0x38] sm:$0xff]  ;;  %v148_v9 = vld [vmem:[%s389_s6 + $0x30] sm:$0xff] }
   0x3   :  { %v31_v2 = vld [vmem:[%s384_s5] sm:$0xff]  ;;  %134 = vmatpush.msra.mxu3 %v94_v1  ;;  %v155_v10 = vld [vmem:[%s388_s7 + $0x28] sm:$0xff]  ;;  %v153_v16 = vld [vmem:[%s388_s7 + $0x18] sm:$0xff] }
   0x4   :  { %v29_v3 = vld [vmem:[%s385_s4] sm:$0xff]  ;;  %227 = vmatmul.msk.f32.vlgmr.msra.gmra.mxu2 %vm35_vm0, %v31_v2  ;;  %v147_v11 = vld [vmem:[%s389_s6 + $0x28] sm:$0xff]  ;;  %v145_v17 = vld [vmem:[%s389_s6 + $0x18] sm:$0xff] }
   0x5   :  { %v34_v4 = vld [vmem:[%s386_s1] sm:$0xff]  ;;  %229 = vmatmul.msk.f32.vlgmr.msra.gmra.mxu3 %vm35_vm0, %v29_v3  ;;  %235 = vmatpush.msrb.mxu2 %v157_v6  ;;  %v32_v12 = vld [vmem:[%s384_s5 + $0x8] sm:$0xff]  ;;  %v152_v18 = vld [vmem:[%s388_s7 + $0x10] sm:$0xff] }
   0x6   :  { %v33_v5 = vld [vmem:[%s387_s0] sm:$0xff]  ;;  %57 = vmatpush.msra.mxu0 %v34_v4  ;;  %243 = vmatpush.msrb.mxu3 %v149_v7  ;;  %v30_v13 = vld [vmem:[%s385_s4 + $0x8] sm:$0xff]  ;;  %v144_v19 = vld [vmem:[%s389_s6 + $0x10] sm:$0xff] }
   0x7   :  { %86 = vmatpush.msra.mxu1 %v33_v5  ;;  %223 = vmatmul.msk.f32.vlgmr.msra.gmra.mxu0 %vm35_vm0, %v31_v2  ;;  %v154_v14 = vld [vmem:[%s388_s7 + $0x20] sm:$0xff]  ;;  %v151_v20 = vld [vmem:[%s388_s7 + $0x8] sm:$0xff] }
   0x8   :  { %225 = vmatmul.msk.f32.vlgmr.msra.gmra.mxu1 %vm35_vm0, %v29_v3  ;;  %173 = vmatpush.msrb.mxu0 %v157_v6  ;;  %v146_v15 = vld [vmem:[%s389_s6 + $0x20] sm:$0xff]  ;;  %v143_v21 = vld [vmem:[%s389_s6 + $0x8] sm:$0xff] }
   0x9   :  { %202 = vmatpush.msrb.mxu1 %v149_v7  ;;  %236 = vmatpush.msrb.mxu2 %v156_v8  ;;  %v150_v22 = vld [vmem:[%s388_s7] sm:$0xff] }
   0xa   :  { %174 = vmatpush.msrb.mxu0 %v156_v8  ;;  %244 = vmatpush.msrb.mxu3 %v148_v9  ;;  %v142_v23 = vld [vmem:[%s389_s6] sm:$0xff] }
   0xb   :  { %203 = vmatpush.msrb.mxu1 %v148_v9  ;;  %237 = vmatpush.msrb.mxu2 %v155_v10 }
   0xc   :  { %175 = vmatpush.msrb.mxu0 %v155_v10  ;;  %228 = vmatmul.msk.f32.gmra.mxu2 %vm35_vm0, %v32_v12 }
   0xd   :  { %204 = vmatpush.msrb.mxu1 %v147_v11  ;;  %230 = vmatmul.msk.f32.gmra.mxu3 %vm35_vm0, %v30_v13 }
   0xe   :  { %176 = vmatpush.msrb.mxu0 %v154_v14  ;;  %245 = vmatpush.msrb.mxu3 %v147_v11 }
   0xf   :  { %205 = vmatpush.msrb.mxu1 %v146_v15  ;;  %224 = vmatmul.msk.f32.gmra.mxu0 %vm35_vm0, %v32_v12 }
  0x10   :  { %226 = vmatmul.msk.f32.gmra.mxu1 %vm35_vm0, %v30_v13  ;;  %177 = vmatpush.msrb.mxu0 %v153_v16 }
  0x11   :  { %206 = vmatpush.msrb.mxu1 %v145_v17  ;;  %238 = vmatpush.msrb.mxu2 %v154_v14 }
  0x12   :  { %178 = vmatpush.msrb.mxu0 %v152_v18  ;;  %246 = vmatpush.msrb.mxu3 %v146_v15 }
  0x13   :  { %207 = vmatpush.msrb.mxu1 %v144_v19  ;;  %239 = vmatpush.msrb.mxu2 %v153_v16 }
  0x14   :  { %247 = vmatpush.msrb.mxu3 %v145_v17  ;;  %179 = vmatpush.msrb.mxu0 %v151_v20 }
  0x15   :  { %240 = vmatpush.msrb.mxu2 %v152_v18  ;;  %208 = vmatpush.msrb.mxu1 %v143_v21 }
  0x16   :  { %248 = vmatpush.msrb.mxu3 %v144_v19  ;;  %180 = vmatpush.msrb.mxu0 %v150_v22 }
  0x17   :  { %241 = vmatpush.msrb.mxu2 %v151_v20  ;;  %209 = vmatpush.msrb.mxu1 %v142_v23 }
  0x18   :  { %249 = vmatpush.msrb.mxu3 %v143_v21 }
  0x19   :  { %242 = vmatpush.msrb.mxu2 %v150_v22 }
  0x1a   :  { %250 = vmatpush.msrb.mxu3 %v142_v23 }
  0x84   :  { %v59_v24 = vpop.f32.mrf.mxu0 }
  0x85   :  { %v88_v25 = vpop.f32.mrf.mxu1 }
  0x86   :  { %v89_v26 = vadd.f32 %v88_v25, %v59_v24 }
  0x87   :  { %v113_v27 = vpop.f32.mrf.mxu2 }
  0x88   :  { %233 = vmatmul.msk.f32.vlgmr.msrb.gmra.mxu1 %vm158_vm1, %v89_v26  ;;  %v136_v28 = vpop.f32.mrf.mxu3 }
  0x89   :  { %v137_v29 = vadd.f32 %v136_v28, %v113_v27 }
  0x8b   :  { %231 = vmatmul.msk.f32.vlgmr.msrb.gmra.mxu0 %vm158_vm1, %v137_v29 }
  0x8c   :  { %v62_v30 = vpop.f32.mrf.mxu0 }
  0x8d   :  { %v91_v31 = vpop.f32.mrf.mxu1 }
  0x8e   :  { %v92_v32 = vadd.f32 %v91_v31, %v62_v30 }
  0x8f   :  { %v116_v33 = vpop.f32.mrf.mxu2 }
  0x90   :  { %234 = vmatmul.msk.f32.vlgmr.msrb.gmra.mxu3 %vm158_vm1, %v92_v32  ;;  %v139_v34 = vpop.f32.mrf.mxu3 }
  0x91   :  { %v140_v35 = vadd.f32 %v139_v34, %v116_v33 }
  0x93   :  { %232 = vmatmul.msk.f32.vlgmr.msrb.gmra.mxu2 %vm158_vm1, %v140_v35 }
 0x105   :  { %v211_v36 = vpop.f32.mrf.mxu1 }
 0x108   :  { %v182_v37 = vpop.f32.mrf.mxu0 }
 0x109   :  { %v212_v38 = vadd.f32 %v211_v36, %v182_v37 }
 0x10b   :  { %217 = vst [vmem:[%s390_s8] sm:$0xff] %v212_v38 }
 0x113   :  { %v214_v39 = vpop.f32.mrf.mxu3 }
 0x116   :  { %v185_v40 = vpop.f32.mrf.mxu2 }
 0x117   :  { %v215_v41 = vadd.f32 %v214_v39, %v185_v40 }
 0x119   :  { %218 = vst [vmem:[%s390_s8 + $0x8] sm:$0xff] %v215_v41 }

</bundles_post_ra>
